<compile_context>
chip_gen: v5e
topology: v5e:2x2
jax: 0.10.0
libtpu: 0.0.40
codegen_flags: <defaults>
</compile_context>

<pallas_src>
import functools

import numpy as np
import jax
import jax.numpy as jnp
from jax import lax
from jax.experimental import pallas as pl
from jax.experimental.pallas import tpu as pltpu


_TAPS = tuple((dy, dx) for dy in (-1, 0, 1) for dx in (-1, 0, 1))
_CENTER = 4  # index of the (0, 0) tap in _TAPS


def _decoder_kernel(x_ref, w1_ref, b1_ref, w2_ref, b2_ref, m_ref, o_ref,
                    p1_ref, p2_ref, *, W):
    """Fused conv3x3+ReLU -> conv3x3+ReLU on the batch-merged image slab.

    x_ref : (Cpad, N*HW)    input, channels on sublanes, fused pixels on lanes
    w1_ref: (C1, 9*Cpad)    conv1 weights, K ordered tap-major / channel-minor
    b1_ref: (C1, 1)
    w2_ref: (Cout, 9*C1)    conv2 weights, same K ordering
    b2_ref: (Cout, 1)
    m_ref : (9, N*HW)       host-precomputed per-tap validity masks (float32)
    o_ref : (Cout, N*HW)
    p1_ref: (9*Cpad, N*HW)  VMEM scratch: conv1 im2col patch matrix
    p2_ref: (9*C1, N*HW)    VMEM scratch: conv2 im2col patch matrix
    """
    NHW = x_ref.shape[1]

    def im2col(a, p_ref):
        # Build the patch matrix with static, sublane-aligned stores into VMEM
        # scratch (no relayout).  Shifted taps use XLU lane rotation; positions
        # that fall outside their own image (incl. cross-image wrap from the
        # fused lane axis) are zeroed by the precomputed masks.  The center tap
        # needs neither roll nor mask.
        C = a.shape[0]
        for t, (dy, dx) in enumerate(_TAPS):
            off = dy * W + dx
            if t == _CENTER:
                tap = a
            else:
                tap = pltpu.roll(a, (-off) % NHW, 1) * m_ref[pl.ds(t, 1), :]
            p_ref[pl.ds(t * C, C), :] = tap

    # ---- conv1 (3x3, pad 1) + bias + ReLU : one MXU matmul -----------------
    im2col(x_ref[...], p1_ref)
    h1 = jnp.dot(w1_ref[...], p1_ref[...], preferred_element_type=jnp.float32)
    h1 = jnp.maximum(h1 + b1_ref[...], 0.0)                  # (C1, N*HW)

    # ---- conv2 (3x3, pad 1) + bias + ReLU : one MXU matmul -----------------
    im2col(h1, p2_ref)
    h2 = jnp.dot(w2_ref[...], p2_ref[...], preferred_element_type=jnp.float32)
    # Lane-dense store: last dim N*HW is a multiple of 128 -> unmasked vst.
    o_ref[...] = jnp.maximum(h2 + b2_ref[...], 0.0)


@jax.jit
def _decoder_apply(x, w1r, b1r, w2r, b2r, masks):
    """Jitted forward: (N, Cin, H, W) f32 -> (N, Cout, H, W) f32."""
    N, Cin, H, W = x.shape
    NHW = N * H * W
    C1 = w1r.shape[0]
    Cout = w2r.shape[0]
    Cpad = w1r.shape[1] // 9

    # NCHW -> (Cin, N*HW): channels on sublanes, fused batch*pixels on lanes.
    xt = jnp.transpose(x, (1, 0, 2, 3)).reshape(Cin, NHW).astype(jnp.float32)
    if Cpad > Cin:  # zero-pad channels to a full 8-row sublane tile
        xt = jnp.concatenate(
            [xt, jnp.zeros((Cpad - Cin, NHW), jnp.float32)], axis=0)

    out = pl.pallas_call(
        functools.partial(_decoder_kernel, W=W),
        out_shape=jax.ShapeDtypeStruct((Cout, NHW), jnp.float32),
        # no grid: single invocation, every operand fully VMEM-resident
        scratch_shapes=[
            pltpu.VMEM((9 * Cpad, NHW), jnp.float32),
            pltpu.VMEM((9 * C1, NHW), jnp.float32),
        ],
    )(xt, w1r, b1r, w2r, b2r, masks)

    # Back to NCHW (tiny relayout inside the jitted wrapper).
    return jnp.transpose(out.reshape(Cout, N, H, W), (1, 0, 2, 3))


def _round_up(v, m):
    return ((v + m - 1) // m) * m


def prepare_decoder_params(w1, b1, w2, b2):
    """One-time (init-time) re-layout of PyTorch Conv2d parameters.

    w1: (C1, Cin, 3, 3), b1: (C1,), w2: (Cout, C1, 3, 3), b2: (Cout,)
    K index = (ky*3 + kx) * Cpad + cin, matching the kernel's im2col ordering;
    Cin is zero-padded to a full 8-row sublane tile.
    """
    w1 = np.asarray(w1, np.float32)
    w2 = np.asarray(w2, np.float32)
    C1, Cin = w1.shape[0], w1.shape[1]
    Cout = w2.shape[0]
    Cpad = max(8, _round_up(Cin, 8))

    w1t = np.zeros((C1, 3, 3, Cpad), np.float32)
    w1t[..., :Cin] = np.transpose(w1, (0, 2, 3, 1))          # (C1, ky, kx, Cin)
    w1r = jnp.asarray(w1t.reshape(C1, 9 * Cpad))

    w2r = jnp.asarray(np.transpose(w2, (0, 2, 3, 1)).reshape(Cout, 9 * C1))

    b1r = jnp.asarray(np.asarray(b1, np.float32).reshape(C1, 1))
    b2r = jnp.asarray(np.asarray(b2, np.float32).reshape(Cout, 1))
    return w1r, b1r, w2r, b2r


@functools.lru_cache(maxsize=None)
def _tap_masks(N, H, W):
    """Host-precomputed per-tap validity masks, shape (9, N*H*W), float32."""
    HW = H * W
    pos = np.arange(N * HW)
    yy = (pos % HW) // W          # per-image row (taps never leak across images)
    xx = pos % W                  # per-image column
    rows = []
    for dy, dx in _TAPS:
        rows.append(((yy + dy >= 0) & (yy + dy < H) &
                     (xx + dx >= 0) & (xx + dx < W)).astype(np.float32))
    return jnp.asarray(np.stack(rows, axis=0))


class DecoderPallas:
    """Pallas equivalent of the PyTorch Decoder (conv3x3 + ReLU, twice)."""

    def __init__(self, w1, b1, w2, b2):
        self.params = prepare_decoder_params(w1, b1, w2, b2)

    def __call__(self, x_nchw):
        N, _, H, W = x_nchw.shape
        masks = _tap_masks(N, H, W)
        return _decoder_apply(x_nchw, *self.params, masks)


def _reference_forward(x_nchw, w1, b1, w2, b2):
    """Pure-JAX reference with PyTorch conv semantics (NCHW, OIHW)."""
    dn = lax.conv_dimension_numbers(x_nchw.shape, w1.shape,
                                    ("NCHW", "OIHW", "NCHW"))
    h = lax.conv_general_dilated(x_nchw, w1, (1, 1), ((1, 1), (1, 1)),
                                 dimension_numbers=dn,
                                 precision=lax.Precision.HIGHEST)
    h = jax.nn.relu(h + b1[None, :, None, None])
    dn2 = lax.conv_dimension_numbers(h.shape, w2.shape,
                                     ("NCHW", "OIHW", "NCHW"))
    h = lax.conv_general_dilated(h, w2, (1, 1), ((1, 1), (1, 1)),
                                 dimension_numbers=dn2,
                                 precision=lax.Precision.HIGHEST)
    return jax.nn.relu(h + b2[None, :, None, None])


if __name__ == "__main__":
    # Small shapes consistent with the module: N=2, in_channels=4, H=W=16,
    # out_channels=8 (conv1 always produces 16 channels).
    N, Cin, H, W = 2, 4, 16, 16
    C1, Cout = 16, 8

    key = jax.random.PRNGKey(0)
    kx, kw1, kb1, kw2, kb2 = jax.random.split(key, 5)

    x = jax.random.normal(kx, (N, Cin, H, W), dtype=jnp.float32)
    # PyTorch Conv2d parameter shapes: OIHW weights, O biases.
    w1 = jax.random.normal(kw1, (C1, Cin, 3, 3), dtype=jnp.float32) * 0.1
    b1 = jax.random.normal(kb1, (C1,), dtype=jnp.float32) * 0.1
    w2 = jax.random.normal(kw2, (Cout, C1, 3, 3), dtype=jnp.float32) * 0.1
    b2 = jax.random.normal(kb2, (Cout,), dtype=jnp.float32) * 0.1

    decoder = DecoderPallas(w1, b1, w2, b2)   # init-time weight re-layout
    out = jax.block_until_ready(decoder(x))

    ref = jax.block_until_ready(_reference_forward(x, w1, b1, w2, b2))
    assert out.shape == (N, Cout, H, W), out.shape
    max_err = float(jnp.max(jnp.abs(out - ref)))
    assert max_err < 1e-3, max_err

    print("KERNEL_OK")
</pallas_src>

<mosaic_0001>
module attributes {stable_mosaic.version = 11 : i64} {
  func.func @_decoder_kernel(%arg0: memref<8x512xf32, #tpu.memory_space<vmem>>, %arg1: memref<16x72xf32, #tpu.memory_space<vmem>>, %arg2: memref<16x1xf32, #tpu.memory_space<vmem>>, %arg3: memref<8x144xf32, #tpu.memory_space<vmem>>, %arg4: memref<8x1xf32, #tpu.memory_space<vmem>>, %arg5: memref<9x512xf32, #tpu.memory_space<vmem>>, %arg6: memref<8x512xf32, #tpu.memory_space<vmem>>, %arg7: memref<72x512xf32, #tpu.memory_space<vmem>>, %arg8: memref<144x512xf32, #tpu.memory_space<vmem>>) attributes {dimension_semantics = [], scalar_prefetch = 0 : i64, scratch_operands = 2 : i64, tpu.core_type = #tpu.core_type<tc>} {
    %c0 = arith.constant 0 : index
    %c0_0 = arith.constant 0 : index
    %0 = vector.load %arg0[%c0, %c0_0] : memref<8x512xf32, #tpu.memory_space<vmem>>, vector<8x512xf32>
    %c17_i32 = arith.constant 17 : i32
    %1 = tpu.dynamic_rotate %0 by %c17_i32 dim 1 : vector<8x512xf32>, i32 -> vector<8x512xf32>
    %c0_1 = arith.constant 0 : index
    %c0_2 = arith.constant 0 : index
    %2 = vector.load %arg5[%c0_1, %c0_2] : memref<9x512xf32, #tpu.memory_space<vmem>>, vector<1x512xf32>
    %3 = vector.broadcast %2 : vector<1x512xf32> to vector<8x512xf32>
    %4 = arith.mulf %1, %3 : vector<8x512xf32>
    %c0_3 = arith.constant 0 : index
    %c0_4 = arith.constant 0 : index
    %5 = vector.load %arg7[%c0_3, %c0_4] : memref<72x512xf32, #tpu.memory_space<vmem>>, vector<8x512xf32>
    tpu.vector_store %arg7[%c0_3, %c0_4], %4 {strides = array<i32>} : memref<72x512xf32, #tpu.memory_space<vmem>>, vector<8x512xf32>,
    %c16_i32 = arith.constant 16 : i32
    %6 = tpu.dynamic_rotate %0 by %c16_i32 dim 1 : vector<8x512xf32>, i32 -> vector<8x512xf32>
    %c1 = arith.constant 1 : index
    %c0_5 = arith.constant 0 : index
    %7 = vector.load %arg5[%c1, %c0_5] : memref<9x512xf32, #tpu.memory_space<vmem>>, vector<1x512xf32>
    %8 = vector.broadcast %7 : vector<1x512xf32> to vector<8x512xf32>
    %9 = arith.mulf %6, %8 : vector<8x512xf32>
    %c8 = arith.constant 8 : index
    %c0_6 = arith.constant 0 : index
    %10 = vector.load %arg7[%c8, %c0_6] : memref<72x512xf32, #tpu.memory_space<vmem>>, vector<8x512xf32>
    tpu.vector_store %arg7[%c8, %c0_6], %9 {strides = array<i32>} : memref<72x512xf32, #tpu.memory_space<vmem>>, vector<8x512xf32>,
    %c15_i32 = arith.constant 15 : i32
    %11 = tpu.dynamic_rotate %0 by %c15_i32 dim 1 : vector<8x512xf32>, i32 -> vector<8x512xf32>
    %c2 = arith.constant 2 : index
    %c0_7 = arith.constant 0 : index
    %12 = vector.load %arg5[%c2, %c0_7] : memref<9x512xf32, #tpu.memory_space<vmem>>, vector<1x512xf32>
    %13 = vector.broadcast %12 : vector<1x512xf32> to vector<8x512xf32>
    %14 = arith.mulf %11, %13 : vector<8x512xf32>
    %c16 = arith.constant 16 : index
    %c0_8 = arith.constant 0 : index
    %15 = vector.load %arg7[%c16, %c0_8] : memref<72x512xf32, #tpu.memory_space<vmem>>, vector<8x512xf32>
    tpu.vector_store %arg7[%c16, %c0_8], %14 {strides = array<i32>} : memref<72x512xf32, #tpu.memory_space<vmem>>, vector<8x512xf32>,
    %c1_i32 = arith.constant 1 : i32
    %16 = tpu.dynamic_rotate %0 by %c1_i32 dim 1 : vector<8x512xf32>, i32 -> vector<8x512xf32>
    %c3 = arith.constant 3 : index
    %c0_9 = arith.constant 0 : index
    %17 = vector.load %arg5[%c3, %c0_9] : memref<9x512xf32, #tpu.memory_space<vmem>>, vector<1x512xf32>
    %18 = vector.broadcast %17 : vector<1x512xf32> to vector<8x512xf32>
    %19 = arith.mulf %16, %18 : vector<8x512xf32>
    %c24 = arith.constant 24 : index
    %c0_10 = arith.constant 0 : index
    %20 = vector.load %arg7[%c24, %c0_10] : memref<72x512xf32, #tpu.memory_space<vmem>>, vector<8x512xf32>
    tpu.vector_store %arg7[%c24, %c0_10], %19 {strides = array<i32>} : memref<72x512xf32, #tpu.memory_space<vmem>>, vector<8x512xf32>,
    %c32 = arith.constant 32 : index
    %c0_11 = arith.constant 0 : index
    %21 = vector.load %arg7[%c32, %c0_11] : memref<72x512xf32, #tpu.memory_space<vmem>>, vector<8x512xf32>
    tpu.vector_store %arg7[%c32, %c0_11], %0 {strides = array<i32>} : memref<72x512xf32, #tpu.memory_space<vmem>>, vector<8x512xf32>,
    %c511_i32 = arith.constant 511 : i32
    %22 = tpu.dynamic_rotate %0 by %c511_i32 dim 1 : vector<8x512xf32>, i32 -> vector<8x512xf32>
    %c5 = arith.constant 5 : index
    %c0_12 = arith.constant 0 : index
    %23 = vector.load %arg5[%c5, %c0_12] : memref<9x512xf32, #tpu.memory_space<vmem>>, vector<1x512xf32>
    %24 = vector.broadcast %23 : vector<1x512xf32> to vector<8x512xf32>
    %25 = arith.mulf %22, %24 : vector<8x512xf32>
    %c40 = arith.constant 40 : index
    %c0_13 = arith.constant 0 : index
    %26 = vector.load %arg7[%c40, %c0_13] : memref<72x512xf32, #tpu.memory_space<vmem>>, vector<8x512xf32>
    tpu.vector_store %arg7[%c40, %c0_13], %25 {strides = array<i32>} : memref<72x512xf32, #tpu.memory_space<vmem>>, vector<8x512xf32>,
    %c497_i32 = arith.constant 497 : i32
    %27 = tpu.dynamic_rotate %0 by %c497_i32 dim 1 : vector<8x512xf32>, i32 -> vector<8x512xf32>
    %c6 = arith.constant 6 : index
    %c0_14 = arith.constant 0 : index
    %28 = vector.load %arg5[%c6, %c0_14] : memref<9x512xf32, #tpu.memory_space<vmem>>, vector<1x512xf32>
    %29 = vector.broadcast %28 : vector<1x512xf32> to vector<8x512xf32>
    %30 = arith.mulf %27, %29 : vector<8x512xf32>
    %c48 = arith.constant 48 : index
    %c0_15 = arith.constant 0 : index
    %31 = vector.load %arg7[%c48, %c0_15] : memref<72x512xf32, #tpu.memory_space<vmem>>, vector<8x512xf32>
    tpu.vector_store %arg7[%c48, %c0_15], %30 {strides = array<i32>} : memref<72x512xf32, #tpu.memory_space<vmem>>, vector<8x512xf32>,
    %c496_i32 = arith.constant 496 : i32
    %32 = tpu.dynamic_rotate %0 by %c496_i32 dim 1 : vector<8x512xf32>, i32 -> vector<8x512xf32>
    %c7 = arith.constant 7 : index
    %c0_16 = arith.constant 0 : index
    %33 = vector.load %arg5[%c7, %c0_16] : memref<9x512xf32, #tpu.memory_space<vmem>>, vector<1x512xf32>
    %34 = vector.broadcast %33 : vector<1x512xf32> to vector<8x512xf32>
    %35 = arith.mulf %32, %34 : vector<8x512xf32>
    %c56 = arith.constant 56 : index
    %c0_17 = arith.constant 0 : index
    %36 = vector.load %arg7[%c56, %c0_17] : memref<72x512xf32, #tpu.memory_space<vmem>>, vector<8x512xf32>
    tpu.vector_store %arg7[%c56, %c0_17], %35 {strides = array<i32>} : memref<72x512xf32, #tpu.memory_space<vmem>>, vector<8x512xf32>,
    %c495_i32 = arith.constant 495 : i32
    %37 = tpu.dynamic_rotate %0 by %c495_i32 dim 1 : vector<8x512xf32>, i32 -> vector<8x512xf32>
    %c8_18 = arith.constant 8 : index
    %c0_19 = arith.constant 0 : index
    %38 = vector.load %arg5[%c8_18, %c0_19] : memref<9x512xf32, #tpu.memory_space<vmem>>, vector<1x512xf32>
    %39 = vector.broadcast %38 : vector<1x512xf32> to vector<8x512xf32>
    %40 = arith.mulf %37, %39 : vector<8x512xf32>
    %c64 = arith.constant 64 : index
    %c0_20 = arith.constant 0 : index
    %41 = vector.load %arg7[%c64, %c0_20] : memref<72x512xf32, #tpu.memory_space<vmem>>, vector<8x512xf32>
    tpu.vector_store %arg7[%c64, %c0_20], %40 {strides = array<i32>} : memref<72x512xf32, #tpu.memory_space<vmem>>, vector<8x512xf32>,
    %c0_21 = arith.constant 0 : index
    %c0_22 = arith.constant 0 : index
    %42 = vector.load %arg1[%c0_21, %c0_22] : memref<16x72xf32, #tpu.memory_space<vmem>>, vector<16x72xf32>
    %c0_23 = arith.constant 0 : index
    %c0_24 = arith.constant 0 : index
    %43 = vector.load %arg7[%c0_23, %c0_24] : memref<72x512xf32, #tpu.memory_space<vmem>>, vector<72x512xf32>
    %cst = arith.constant dense<0.000000e+00> : vector<16x512xf32>
    %44 = tpu.matmul %42, %43, %cst {dimension_numbers = #tpu.dot_dimension_numbers<[1], [0], [0], [1], [0, 0, 1, 1], [], []>} : vector<16x72xf32>, vector<72x512xf32>, vector<16x512xf32> -> vector<16x512xf32>
    %c0_25 = arith.constant 0 : index
    %c0_26 = arith.constant 0 : index
    %45 = vector.load %arg2[%c0_25, %c0_26] : memref<16x1xf32, #tpu.memory_space<vmem>>, vector<16x1xf32>
    %46 = vector.broadcast %45 : vector<16x1xf32> to vector<16x512xf32>
    %47 = arith.addf %44, %46 : vector<16x512xf32>
    %cst_27 = arith.constant 0.000000e+00 : f32
    %48 = vector.broadcast %cst_27 : f32 to vector<16x512xf32>
    %49 = arith.maximumf %47, %48 : vector<16x512xf32>
    %c17_i32_28 = arith.constant 17 : i32
    %50 = tpu.dynamic_rotate %49 by %c17_i32_28 dim 1 : vector<16x512xf32>, i32 -> vector<16x512xf32>
    %c0_29 = arith.constant 0 : index
    %c0_30 = arith.constant 0 : index
    %51 = vector.load %arg5[%c0_29, %c0_30] : memref<9x512xf32, #tpu.memory_space<vmem>>, vector<1x512xf32>
    %52 = vector.broadcast %51 : vector<1x512xf32> to vector<16x512xf32>
    %53 = arith.mulf %50, %52 : vector<16x512xf32>
    %c0_31 = arith.constant 0 : index
    %c0_32 = arith.constant 0 : index
    %54 = vector.load %arg8[%c0_31, %c0_32] : memref<144x512xf32, #tpu.memory_space<vmem>>, vector<16x512xf32>
    tpu.vector_store %arg8[%c0_31, %c0_32], %53 {strides = array<i32>} : memref<144x512xf32, #tpu.memory_space<vmem>>, vector<16x512xf32>,
    %c16_i32_33 = arith.constant 16 : i32
    %55 = tpu.dynamic_rotate %49 by %c16_i32_33 dim 1 : vector<16x512xf32>, i32 -> vector<16x512xf32>
    %c1_34 = arith.constant 1 : index
    %c0_35 = arith.constant 0 : index
    %56 = vector.load %arg5[%c1_34, %c0_35] : memref<9x512xf32, #tpu.memory_space<vmem>>, vector<1x512xf32>
    %57 = vector.broadcast %56 : vector<1x512xf32> to vector<16x512xf32>
    %58 = arith.mulf %55, %57 : vector<16x512xf32>
    %c16_36 = arith.constant 16 : index
    %c0_37 = arith.constant 0 : index
    %59 = vector.load %arg8[%c16_36, %c0_37] : memref<144x512xf32, #tpu.memory_space<vmem>>, vector<16x512xf32>
    tpu.vector_store %arg8[%c16_36, %c0_37], %58 {strides = array<i32>} : memref<144x512xf32, #tpu.memory_space<vmem>>, vector<16x512xf32>,
    %c15_i32_38 = arith.constant 15 : i32
    %60 = tpu.dynamic_rotate %49 by %c15_i32_38 dim 1 : vector<16x512xf32>, i32 -> vector<16x512xf32>
    %c2_39 = arith.constant 2 : index
    %c0_40 = arith.constant 0 : index
    %61 = vector.load %arg5[%c2_39, %c0_40] : memref<9x512xf32, #tpu.memory_space<vmem>>, vector<1x512xf32>
    %62 = vector.broadcast %61 : vector<1x512xf32> to vector<16x512xf32>
    %63 = arith.mulf %60, %62 : vector<16x512xf32>
    %c32_41 = arith.constant 32 : index
    %c0_42 = arith.constant 0 : index
    %64 = vector.load %arg8[%c32_41, %c0_42] : memref<144x512xf32, #tpu.memory_space<vmem>>, vector<16x512xf32>
    tpu.vector_store %arg8[%c32_41, %c0_42], %63 {strides = array<i32>} : memref<144x512xf32, #tpu.memory_space<vmem>>, vector<16x512xf32>,
    %c1_i32_43 = arith.constant 1 : i32
    %65 = tpu.dynamic_rotate %49 by %c1_i32_43 dim 1 : vector<16x512xf32>, i32 -> vector<16x512xf32>
    %c3_44 = arith.constant 3 : index
    %c0_45 = arith.constant 0 : index
    %66 = vector.load %arg5[%c3_44, %c0_45] : memref<9x512xf32, #tpu.memory_space<vmem>>, vector<1x512xf32>
    %67 = vector.broadcast %66 : vector<1x512xf32> to vector<16x512xf32>
    %68 = arith.mulf %65, %67 : vector<16x512xf32>
    %c48_46 = arith.constant 48 : index
    %c0_47 = arith.constant 0 : index
    %69 = vector.load %arg8[%c48_46, %c0_47] : memref<144x512xf32, #tpu.memory_space<vmem>>, vector<16x512xf32>
    tpu.vector_store %arg8[%c48_46, %c0_47], %68 {strides = array<i32>} : memref<144x512xf32, #tpu.memory_space<vmem>>, vector<16x512xf32>,
    %c64_48 = arith.constant 64 : index
    %c0_49 = arith.constant 0 : index
    %70 = vector.load %arg8[%c64_48, %c0_49] : memref<144x512xf32, #tpu.memory_space<vmem>>, vector<16x512xf32>
    tpu.vector_store %arg8[%c64_48, %c0_49], %49 {strides = array<i32>} : memref<144x512xf32, #tpu.memory_space<vmem>>, vector<16x512xf32>,
    %c511_i32_50 = arith.constant 511 : i32
    %71 = tpu.dynamic_rotate %49 by %c511_i32_50 dim 1 : vector<16x512xf32>, i32 -> vector<16x512xf32>
    %c5_51 = arith.constant 5 : index
    %c0_52 = arith.constant 0 : index
    %72 = vector.load %arg5[%c5_51, %c0_52] : memref<9x512xf32, #tpu.memory_space<vmem>>, vector<1x512xf32>
    %73 = vector.broadcast %72 : vector<1x512xf32> to vector<16x512xf32>
    %74 = arith.mulf %71, %73 : vector<16x512xf32>
    %c80 = arith.constant 80 : index
    %c0_53 = arith.constant 0 : index
    %75 = vector.load %arg8[%c80, %c0_53] : memref<144x512xf32, #tpu.memory_space<vmem>>, vector<16x512xf32>
    tpu.vector_store %arg8[%c80, %c0_53], %74 {strides = array<i32>} : memref<144x512xf32, #tpu.memory_space<vmem>>, vector<16x512xf32>,
    %c497_i32_54 = arith.constant 497 : i32
    %76 = tpu.dynamic_rotate %49 by %c497_i32_54 dim 1 : vector<16x512xf32>, i32 -> vector<16x512xf32>
    %c6_55 = arith.constant 6 : index
    %c0_56 = arith.constant 0 : index
    %77 = vector.load %arg5[%c6_55, %c0_56] : memref<9x512xf32, #tpu.memory_space<vmem>>, vector<1x512xf32>
    %78 = vector.broadcast %77 : vector<1x512xf32> to vector<16x512xf32>
    %79 = arith.mulf %76, %78 : vector<16x512xf32>
    %c96 = arith.constant 96 : index
    %c0_57 = arith.constant 0 : index
    %80 = vector.load %arg8[%c96, %c0_57] : memref<144x512xf32, #tpu.memory_space<vmem>>, vector<16x512xf32>
    tpu.vector_store %arg8[%c96, %c0_57], %79 {strides = array<i32>} : memref<144x512xf32, #tpu.memory_space<vmem>>, vector<16x512xf32>,
    %c496_i32_58 = arith.constant 496 : i32
    %81 = tpu.dynamic_rotate %49 by %c496_i32_58 dim 1 : vector<16x512xf32>, i32 -> vector<16x512xf32>
    %c7_59 = arith.constant 7 : index
    %c0_60 = arith.constant 0 : index
    %82 = vector.load %arg5[%c7_59, %c0_60] : memref<9x512xf32, #tpu.memory_space<vmem>>, vector<1x512xf32>
    %83 = vector.broadcast %82 : vector<1x512xf32> to vector<16x512xf32>
    %84 = arith.mulf %81, %83 : vector<16x512xf32>
    %c112 = arith.constant 112 : index
    %c0_61 = arith.constant 0 : index
    %85 = vector.load %arg8[%c112, %c0_61] : memref<144x512xf32, #tpu.memory_space<vmem>>, vector<16x512xf32>
    tpu.vector_store %arg8[%c112, %c0_61], %84 {strides = array<i32>} : memref<144x512xf32, #tpu.memory_space<vmem>>, vector<16x512xf32>,
    %c495_i32_62 = arith.constant 495 : i32
    %86 = tpu.dynamic_rotate %49 by %c495_i32_62 dim 1 : vector<16x512xf32>, i32 -> vector<16x512xf32>
    %c8_63 = arith.constant 8 : index
    %c0_64 = arith.constant 0 : index
    %87 = vector.load %arg5[%c8_63, %c0_64] : memref<9x512xf32, #tpu.memory_space<vmem>>, vector<1x512xf32>
    %88 = vector.broadcast %87 : vector<1x512xf32> to vector<16x512xf32>
    %89 = arith.mulf %86, %88 : vector<16x512xf32>
    %c128 = arith.constant 128 : index
    %c0_65 = arith.constant 0 : index
    %90 = vector.load %arg8[%c128, %c0_65] : memref<144x512xf32, #tpu.memory_space<vmem>>, vector<16x512xf32>
    tpu.vector_store %arg8[%c128, %c0_65], %89 {strides = array<i32>} : memref<144x512xf32, #tpu.memory_space<vmem>>, vector<16x512xf32>,
    %c0_66 = arith.constant 0 : index
    %c0_67 = arith.constant 0 : index
    %91 = vector.load %arg3[%c0_66, %c0_67] : memref<8x144xf32, #tpu.memory_space<vmem>>, vector<8x144xf32>
    %c0_68 = arith.constant 0 : index
    %c0_69 = arith.constant 0 : index
    %92 = vector.load %arg8[%c0_68, %c0_69] : memref<144x512xf32, #tpu.memory_space<vmem>>, vector<144x512xf32>
    %cst_70 = arith.constant dense<0.000000e+00> : vector<8x512xf32>
    %93 = tpu.matmul %91, %92, %cst_70 {dimension_numbers = #tpu.dot_dimension_numbers<[1], [0], [0], [1], [0, 0, 1, 1], [], []>} : vector<8x144xf32>, vector<144x512xf32>, vector<8x512xf32> -> vector<8x512xf32>
    %c0_71 = arith.constant 0 : index
    %c0_72 = arith.constant 0 : index
    %94 = vector.load %arg4[%c0_71, %c0_72] : memref<8x1xf32, #tpu.memory_space<vmem>>, vector<8x1xf32>
    %95 = vector.broadcast %94 : vector<8x1xf32> to vector<8x512xf32>
    %96 = arith.addf %93, %95 : vector<8x512xf32>
    %cst_73 = arith.constant 0.000000e+00 : f32
    %97 = vector.broadcast %cst_73 : f32 to vector<8x512xf32>
    %98 = arith.maximumf %96, %97 : vector<8x512xf32>
    %c0_74 = arith.constant 0 : index
    %c0_75 = arith.constant 0 : index
    %99 = vector.load %arg6[%c0_74, %c0_75] : memref<8x512xf32, #tpu.memory_space<vmem>>, vector<8x512xf32>
    tpu.vector_store %arg6[%c0_74, %c0_75], %98 {strides = array<i32>} : memref<8x512xf32, #tpu.memory_space<vmem>>, vector<8x512xf32>,
    return
  }
}

</mosaic_0001>

<bundles_post_ra>
// kernel: _decoder_apply.1
= control target key start
LH: loop header
LB: loop body
LE: loop exit
PB: predicated region body
PF: predicated region fallthrough
CT: control target
= control target key end

     0   :  { %s1146_s23 = smov 112   ;;  %s1147_s24 = smov 111   ;;  %v35_v6 = vlaneseq  ;;  %vm338_vm8 = vcmask 588800   ;;  %vm933_vm9 = vcmask 130048   ;;  %s2085_s0 = inlined_call_operand.vmem [shape: f32[8,512], index: 0, kind: input, shape index: {}]   ;;  %s2086_s5 = inlined_call_operand.vmem [shape: f32[9,512], index: 5, kind: input, shape index: {}]   ;;  %s2087_s2 = inlined_call_operand.vmem [shape: f32[16,1], index: 2, kind: input, shape index: {}]   ;;  %s2088_s1 = inlined_call_operand.vmem [shape: f32[16,72], index: 1, kind: input, shape index: {}]   ;;  %s2089_s4 = inlined_call_operand.vmem [shape: f32[8,1], index: 4, kind: input, shape index: {}]   ;;  %s2090_s3 = inlined_call_operand.vmem [shape: f32[8,144], index: 3, kind: input, shape index: {}]   ;;  %s2091_s6 = inlined_call_operand.vmem [shape: f32[8,512], index: 6, kind: output, shape index: {}]  }
   0x1   :  { %v1193_v0 = vld [vmem:[%s2085_s0 + $0x10] sm:$0xff]  ;;  %s1148_s25 = smov 113   ;;  %v1204_v1 = vld [vmem:[%s2085_s0 + $0x18] sm:$0xff]  ;;  %v1215_v2 = vld [vmem:[%s2085_s0] sm:$0xff]  ;;  %s1149_s30 = smov 127  }
   0x2   :  { %228 = vrot.lane.b32.xlu1 %v1193_v0, %s1146_s23  ;;  %260 = vrot.lane.b32.xlu0 %v1193_v0, %s1147_s24  ;;  %v1226_v3 = vld [vmem:[%s2085_s0 + $0x8] sm:$0xff]  ;;  %s1150_s9 = smov 1   ;;  %s1151_s0 = smov 15   ;;  %v1279_v11 = vand.u32 127, %v35_v6 }
   0x3   :  { %196 = vrot.lane.b32.xlu2 %v1193_v0, %s1148_s25  ;;  %s1152_s10 = smov 16   ;;  %s1153_s11 = smov 17   ;;  %v1115_v10 = vld [vmem:[%s2086_s5 + $0x20] ss:$8 sm:$0xf] }
   0x4   :  { %v1284_v12 = vld [vmem:[%s2086_s5 + $0x6] ss:$8 sm:$0xf]  ;;  %vm200_vm0 = vcmp.lt.s32.totalorder %v1279_v11, 113  ;;  %vm264_vm1 = vcmp.lt.s32.totalorder %v1279_v11, 111  ;;  %v274_v13 = vperm.slane %v1115_v10, 2 }
   0x5   :  { %v275_v14 = vperm.slane %v1115_v10, 3  ;;  %v1114_v15 = vld [vmem:[%s2086_s5 + $0x7] ss:$8 sm:$0xf]  ;;  %vm232_vm2 = vcmp.lt.s32.totalorder %v1279_v11, 112  ;;  %v210_v19 = vperm.slane %v1284_v12, 2 }
   0x6   :  { %v242_v18 = vperm.slane %v1114_v15, 2  ;;  %v1305_v27 = vld [vmem:[%s2086_s5 + $0x5] ss:$8 sm:$0xf]  ;;  %vm168_vm3 = vcmp.lt.s32.totalorder %v1279_v11, 127  ;;  %v272_v36 = vperm.slane %v1115_v10, 0 }
   0x7   :  { %v178_v30 = vperm.slane %v1305_v27, 2  ;;  %v273_v37 = vperm.slane %v1115_v10, 1  ;;  %v243_v38 = vperm.slane %v1114_v15, 3  ;;  %v240_v39 = vperm.slane %v1114_v15, 0 }
   0x8   :  { %v241_v44 = vperm.slane %v1114_v15, 1  ;;  %v211_v45 = vperm.slane %v1284_v12, 3  ;;  %v1334_v54 = vld [vmem:[%s2086_s5 + $0x3] ss:$8 sm:$0xf]  ;;  %vm132_vm4 = vcmp.lt.s32.totalorder %v1279_v11, 1 }
   0x9   :  { %v142_v57 = vperm.slane %v1334_v54, 2  ;;  %v1351_v63 = vld [vmem:[%s2086_s5 + $0x2] ss:$8 sm:$0xf]  ;;  %vm100_vm5 = vcmp.lt.s32.totalorder %v1279_v11, 15  ;;  %vm68_vm6 = vcmp.lt.s32.totalorder %v1279_v11, 16 }
   0xa   :  { %230 = vrot.lane.b32.xlu1 %v1204_v1, %s1146_s23  ;;  %262 = vrot.lane.b32.xlu0 %v1204_v1, %s1147_s24  ;;  %v110_v6 = vperm.slane %v1351_v63, 2  ;;  %vm37_vm7 = vcmp.lt.s32.totalorder %v1279_v11, 17 }
   0xb   :  { %198 = vrot.lane.b32.xlu2 %v1204_v1, %s1148_s25 }
  0x12   :  { %166 = vrot.lane.b32.xlu1 %v1204_v1, %s1149_s30  ;;  %164 = vrot.lane.b32.xlu0 %v1193_v0, %s1149_s30 }
  0x13   :  { %256 = vrot.lane.b32.xlu2 %v1215_v2, %s1147_s24 }
  0x1a   :  { %258 = vrot.lane.b32.xlu0 %v1226_v3, %s1147_s24  ;;  %224 = vrot.lane.b32.xlu1 %v1215_v2, %s1146_s23 }
  0x1b   :  { %226 = vrot.lane.b32.xlu2 %v1226_v3, %s1146_s23 }
  0x22   :  { %126 = vrot.lane.b32.xlu0 %v1226_v3, %s1150_s9  ;;  %128 = vrot.lane.b32.xlu1 %v1193_v0, %s1150_s9 }
  0x23   :  { %192 = vrot.lane.b32.xlu2 %v1215_v2, %s1148_s25 }
  0x2a   :  { %194 = vrot.lane.b32.xlu0 %v1226_v3, %s1148_s25  ;;  %94 = vrot.lane.b32.xlu1 %v1226_v3, %s1151_s0 }
  0x2b   :  { %96 = vrot.lane.b32.xlu2 %v1193_v0, %s1151_s0 }
  0x32   :  { %160 = vrot.lane.b32.xlu0 %v1215_v2, %s1149_s30  ;;  %162 = vrot.lane.b32.xlu1 %v1226_v3, %s1149_s30 }
  0x33   :  { %62 = vrot.lane.b32.xlu2 %v1226_v3, %s1152_s10 }
  0x3a   :  { %64 = vrot.lane.b32.xlu0 %v1193_v0, %s1152_s10  ;;  %29 = vrot.lane.b32.xlu1 %v1226_v3, %s1153_s11 }
  0x3b   :  { %31 = vrot.lane.b32.xlu2 %v1193_v0, %s1153_s11 }
  0x42   :  { %124 = vrot.lane.b32.xlu0 %v1215_v2, %s1150_s9  ;;  %130 = vrot.lane.b32.xlu1 %v1204_v1, %s1150_s9 }
  0x43   :  { %92 = vrot.lane.b32.xlu2 %v1215_v2, %s1151_s0 }
  0x4a   :  { %98 = vrot.lane.b32.xlu0 %v1204_v1, %s1151_s0  ;;  %60 = vrot.lane.b32.xlu1 %v1215_v2, %s1152_s10 }
  0x4b   :  { %66 = vrot.lane.b32.xlu2 %v1204_v1, %s1152_s10 }
  0x52   :  { %27 = vrot.lane.b32.xlu0 %v1215_v2, %s1153_s11  ;;  %33 = vrot.lane.b32.xlu1 %v1204_v1, %s1153_s11 }
  0x5d   :  { %v1274_v4 = vpop.permute.xlu2 %196 }
  0x65   :  { %v199_v5 = vpop.permute.xlu2 %198 }
  0x66   :  { %v201_v20 = vsel %vm200_vm0, %v1274_v4, %v199_v5 }
  0x67   :  { %v218_v29 = vmul.f32 %v210_v19, %v201_v20 }
  0x6d   :  { %v257_v9 = vpop.permute.xlu2 %256 }
  0x74   :  { %v229_v7 = vpop.permute.xlu1 %228  ;;  %v261_v8 = vpop.permute.xlu0 %260 }
  0x75   :  { %v227_v26 = vpop.permute.xlu2 %226 }
  0x76   :  { %v234_v40 = vsel %vm232_vm2, %v227_v26, %v229_v7 }
  0x77   :  { %v249_v55 = vmul.f32 %v241_v44, %v234_v40  ;;  %v141_v40 = vperm.slane %v1334_v54, 1 }
  0x7c   :  { %v231_v16 = vpop.permute.xlu1 %230  ;;  %v263_v17 = vpop.permute.xlu0 %262 }
  0x7d   :  { %v233_v21 = vsel %vm232_vm2, %v229_v7, %v231_v16  ;;  %v265_v22 = vsel %vm264_vm1, %v261_v8, %v263_v17  ;;  %v268_v23 = vsel %vm264_vm1, %v263_v17, %v257_v9  ;;  %v193_v35 = vpop.permute.xlu2 %192  ;;  %v176_v17 = vperm.slane %v1305_v27, 0 }
  0x7e   :  { %v282_v24 = vmul.f32 %v274_v13, %v265_v22  ;;  %v283_v25 = vmul.f32 %v275_v14, %v268_v23  ;;  %v250_v28 = vmul.f32 %v242_v18, %v233_v21  ;;  %v204_v41 = vsel %vm200_vm0, %v199_v5, %v193_v35 }
  0x7f   :  { %v219_v56 = vmul.f32 %v211_v45, %v204_v41  ;;  %v209_v5 = vperm.slane %v1284_v12, 1  ;;  %v177_v18 = vperm.slane %v1305_v27, 1  ;;  %v143_v41 = vperm.slane %v1334_v54, 3 }
  0x80   :  { %398 = vmatpush.msra.mxu2 %v282_v24  ;;  %421 = vmatpush.msra.mxu3 %v283_v25  ;;  %v109_v45 = vperm.slane %v1351_v63, 1 }
  0x82   :  { %399 = vmatpush.msra.mxu2 %v250_v28 }
  0x84   :  { %v1309_v31 = vpop.permute.xlu1 %166  ;;  %400 = vmatpush.msra.mxu2 %v218_v29  ;;  %v1311_v32 = vpop.permute.xlu0 %164  ;;  %v1391_v29 = vld [vmem:[%s2086_s5] ss:$8 sm:$0xf] }
  0x85   :  { %v169_v33 = vsel %vm168_vm3, %v1311_v32, %v1309_v31  ;;  %v1338_v58 = vpop.permute.xlu2 %96 }
  0x86   :  { %v186_v34 = vmul.f32 %v178_v30, %v169_v33  ;;  %v1154_v33 = vmov 0  }
  0x87   :  { %1145 = vset.pattern.permute.xlu0 %v1154_v33  ;;  %1144 = vset.pattern.permute.xlu2 %v1154_v33 }
  0x88   :  { %401 = vmatpush.msra.mxu2 %v186_v34 }
  0x8a   :  { %402 = vmatpush.msra.mxu2 %v1193_v0  ;;  %v208_v0 = vperm.slane %v1284_v12, 0 }
  0x8c   :  { %v259_v42 = vpop.permute.xlu0 %258  ;;  %v225_v43 = vpop.permute.xlu1 %224 }
  0x8d   :  { %v235_v46 = vsel %vm232_vm2, %v225_v43, %v227_v26  ;;  %v236_v47 = vsel %vm232_vm2, %v231_v16, %v225_v43  ;;  %v267_v48 = vsel %vm264_vm1, %v257_v9, %v259_v42  ;;  %v266_v49 = vsel %vm264_vm1, %v259_v42, %v261_v8  ;;  %v1359_v9 = vpop.permute.xlu2 %62  ;;  %v327_v42 = vld [vmem:[%s2087_s2 + $0x8] sm:$0xff] }
  0x8e   :  { %v280_v50 = vmul.f32 %v272_v36, %v267_v48  ;;  %v281_v51 = vmul.f32 %v273_v37, %v266_v49  ;;  %v251_v52 = vmul.f32 %v243_v38, %v236_v47  ;;  %v248_v53 = vmul.f32 %v240_v39, %v235_v46  ;;  %335 = vperm.xlu2 %1144, %v327_v42  }
  0x8f   :  { %v140_v39 = vperm.slane %v1334_v54, 0 }
  0x90   :  { %352 = vmatpush.msra.mxu0 %v280_v50  ;;  %375 = vmatpush.msra.mxu1 %v281_v51 }
  0x91   :  { %422 = vmatpush.msra.mxu3 %v251_v52 }
  0x92   :  { %376 = vmatpush.msra.mxu1 %v249_v55  ;;  %353 = vmatpush.msra.mxu0 %v248_v53  ;;  %v108_v55 = vperm.slane %v1351_v63, 0 }
  0x93   :  { %423 = vmatpush.msra.mxu3 %v219_v56 }
  0x94   :  { %v1340_v59 = vpop.permute.xlu0 %126  ;;  %v1342_v60 = vpop.permute.xlu1 %128 }
  0x95   :  { %v134_v61 = vsel %vm132_vm4, %v1340_v59, %v1342_v60  ;;  %v1381_v28 = vpop.permute.xlu2 %31 }
  0x96   :  { %v150_v62 = vmul.f32 %v142_v57, %v134_v61  ;;  %v111_v57 = vperm.slane %v1351_v63, 3 }
  0x98   :  { %403 = vmatpush.msra.mxu2 %v150_v62 }
  0x9c   :  { %v195_v7 = vpop.permute.xlu0 %194  ;;  %v1357_v8 = vpop.permute.xlu1 %94 }
  0x9d   :  { %v202_v10 = vsel %vm200_vm0, %v195_v7, %v1274_v4  ;;  %v203_v13 = vsel %vm200_vm0, %v193_v35, %v195_v7  ;;  %v102_v14 = vsel %vm100_vm5, %v1357_v8, %v1338_v58  ;;  %v179_v4 = vperm.slane %v1305_v27, 3  ;;  %v1386_v27 = vld [vmem:[%s2086_s5 + $0x1] ss:$8 sm:$0xf]  ;;  %v93_v38 = vpop.permute.xlu2 %92 }
  0x9e   :  { %v216_v12 = vmul.f32 %v208_v0, %v203_v13  ;;  %v217_v15 = vmul.f32 %v209_v5, %v202_v10  ;;  %v118_v16 = vmul.f32 %v110_v6, %v102_v14  ;;  %v78_v30 = vperm.slane %v1386_v27, 2 }
  0x9f   :  { %v103_v46 = vsel %vm100_vm5, %v93_v38, %v1357_v8  ;;  %v77_v56 = vperm.slane %v1386_v27, 1  ;;  %v79_v5 = vperm.slane %v1386_v27, 3 }
  0xa0   :  { %354 = vmatpush.msra.mxu0 %v216_v12  ;;  %377 = vmatpush.msra.mxu1 %v217_v15  ;;  %v117_v53 = vmul.f32 %v109_v45, %v103_v46 }
  0xa1   :  { %404 = vmatpush.msra.mxu2 %v118_v16  ;;  %v45_v16 = vperm.slane %v1391_v29, 1 }
  0xa4   :  { %v161_v19 = vpop.permute.xlu0 %160  ;;  %v163_v20 = vpop.permute.xlu1 %162 }
  0xa5   :  { %v172_v21 = vsel %vm168_vm3, %v1309_v31, %v161_v19  ;;  %v170_v22 = vsel %vm168_vm3, %v163_v20, %v1311_v32  ;;  %v171_v23 = vsel %vm168_vm3, %v161_v19, %v163_v20  ;;  %v46_v31 = vperm.slane %v1391_v29, 2  ;;  %v326_v32 = vld [vmem:[%s2087_s2] sm:$0xff]  ;;  %v67_v54 = vpop.permute.xlu2 %66 }
  0xa6   :  { %v184_v24 = vmul.f32 %v176_v17, %v171_v23  ;;  %v185_v25 = vmul.f32 %v177_v18, %v170_v22  ;;  %v187_v26 = vmul.f32 %v179_v4, %v172_v21  ;;  %330 = vperm.xlu0 %1145, %v326_v32   ;;  %v47_v17 = vperm.slane %v1391_v29, 3 }
  0xa8   :  { %355 = vmatpush.msra.mxu0 %v184_v24  ;;  %378 = vmatpush.msra.mxu1 %v185_v25 }
  0xa9   :  { %424 = vmatpush.msra.mxu3 %v187_v26 }
  0xaa   :  { %356 = vmatpush.msra.mxu0 %v1215_v2  ;;  %379 = vmatpush.msra.mxu1 %v1226_v3 }
  0xab   :  { %425 = vmatpush.msra.mxu3 %v1204_v1  ;;  %v1415_v1 = vld [vmem:[%s2088_s1] sm:$0xff] }
  0xac   :  { %v65_v34 = vpop.permute.xlu0 %64  ;;  %v1403_v35 = vpop.permute.xlu1 %29 }
  0xad   :  { %v70_v2 = vsel %vm68_vm6, %v1359_v9, %v65_v34  ;;  %v39_v3 = vsel %vm37_vm7, %v1403_v35, %v1381_v28  ;;  %v69_v61 = vsel %vm68_vm6, %v65_v34, %v67_v54 }
  0xae   :  { %v86_v36 = vmul.f32 %v78_v30, %v70_v2  ;;  %v54_v37 = vmul.f32 %v46_v31, %v39_v3  ;;  %v87_v15 = vmul.f32 %v79_v5, %v69_v61 }
  0xb0   :  { %405 = vmatpush.msra.mxu2 %v86_v36 }
  0xb2   :  { %406 = vmatpush.msra.mxu2 %v54_v37 }
  0xb3   :  { %1120 = vmatmul.msk.f32.vlgmr.msra.gmra.mxu2 %vm338_vm8, %v1415_v1 }
  0xb4   :  { %v125_v43 = vpop.permute.xlu0 %124  ;;  %v131_v44 = vpop.permute.xlu1 %130 }
  0xb5   :  { %v135_v47 = vsel %vm132_vm4, %v125_v43, %v1340_v59  ;;  %v133_v48 = vsel %vm132_vm4, %v1342_v60, %v131_v44  ;;  %v136_v49 = vsel %vm132_vm4, %v131_v44, %v125_v43  ;;  %v76_v59 = vperm.slane %v1386_v27, 0  ;;  %v289_v60 = vld [vmem:[%s2088_s1 + $0x8] sm:$0xff] }
  0xb6   :  { %v148_v50 = vmul.f32 %v140_v39, %v136_v49  ;;  %v149_v51 = vmul.f32 %v141_v40, %v135_v47  ;;  %v151_v52 = vmul.f32 %v143_v41, %v133_v48 }
  0xb8   :  { %357 = vmatpush.msra.mxu0 %v148_v50  ;;  %380 = vmatpush.msra.mxu1 %v149_v51 }
  0xb9   :  { %426 = vmatpush.msra.mxu3 %v151_v52 }
  0xba   :  { %381 = vmatpush.msra.mxu1 %v117_v53 }
  0xbb   :  { %1121 = vmatmul.msk.f32.gmra.mxu2 %vm338_vm8, %v289_v60 }
  0xbc   :  { %v99_v62 = vpop.permute.xlu0 %98  ;;  %v61_v0 = vpop.permute.xlu1 %60 }
  0xbd   :  { %v101_v6 = vsel %vm100_vm5, %v1338_v58, %v99_v62  ;;  %v104_v63 = vsel %vm100_vm5, %v99_v62, %v93_v38  ;;  %v71_v7 = vsel %vm68_vm6, %v61_v0, %v1359_v9  ;;  %v72_v8 = vsel %vm68_vm6, %v67_v54, %v61_v0 }
  0xbe   :  { %v116_v10 = vmul.f32 %v108_v55, %v104_v63  ;;  %v85_v13 = vmul.f32 %v77_v56, %v71_v7  ;;  %v119_v14 = vmul.f32 %v111_v57, %v101_v6  ;;  %v84_v12 = vmul.f32 %v76_v59, %v72_v8 }
  0xbf   :  { %v44_v58 = vperm.slane %v1391_v29, 0 }
  0xc0   :  { %358 = vmatpush.msra.mxu0 %v116_v10  ;;  %382 = vmatpush.msra.mxu1 %v85_v13  ;;  %v1642_v10 = vld [vmem:[%s2086_s5 + $0x6] ss:$8 sm:$0xf] }
  0xc1   :  { %427 = vmatpush.msra.mxu3 %v119_v14  ;;  %v2093_v13 = vperm.slane %v1642_v10, 2 }
  0xc2   :  { %359 = vmatpush.msra.mxu0 %v84_v12 }
  0xc3   :  { %428 = vmatpush.msra.mxu3 %v87_v15 }
  0xc4   :  { %v28_v9 = vpop.permute.xlu0 %27  ;;  %v34_v18 = vpop.permute.xlu1 %33 }
  0xc5   :  { %v40_v4 = vsel %vm37_vm7, %v28_v9, %v1403_v35  ;;  %v38_v19 = vsel %vm37_vm7, %v1381_v28, %v34_v18  ;;  %v41_v20 = vsel %vm37_vm7, %v34_v18, %v28_v9 }
  0xc6   :  { %v52_v21 = vmul.f32 %v44_v58, %v41_v20  ;;  %v53_v22 = vmul.f32 %v45_v16, %v40_v4  ;;  %v55_v23 = vmul.f32 %v47_v17, %v38_v19 }
  0xc8   :  { %360 = vmatpush.msra.mxu0 %v52_v21  ;;  %383 = vmatpush.msra.mxu1 %v53_v22 }
  0xc9   :  { %429 = vmatpush.msra.mxu3 %v55_v23  ;;  %1116 = vmatmul.msk.f32.vlgmr.msra.gmra.mxu0 %vm338_vm8, %v1415_v1 }
  0xca   :  { %1118 = vmatmul.msk.f32.vlgmr.msra.gmra.mxu1 %vm338_vm8, %v1415_v1  ;;  %1122 = vmatmul.msk.f32.vlgmr.msra.gmra.mxu3 %vm338_vm8, %v1415_v1 }
  0xd1   :  { %1117 = vmatmul.msk.f32.gmra.mxu0 %vm338_vm8, %v289_v60 }
  0xd2   :  { %1119 = vmatmul.msk.f32.gmra.mxu1 %vm338_vm8, %v289_v60  ;;  %1123 = vmatmul.msk.f32.gmra.mxu3 %vm338_vm8, %v289_v60  ;;  %v1613_v60 = vld [vmem:[%s2086_s5 + $0x7] ss:$8 sm:$0xf] }
  0xd3   :  { %v782_v61 = vperm.slane %v1613_v60, 3  ;;  %v2094_v21 = vperm.slane %v1613_v60, 2 }
  0xe8   :  { %v336_v36 = vpop.permute.xlu2 %335 }
 0x118   :  { %v331_v24 = vpop.permute.xlu0 %330 }
 0x136   :  { %v408_v29 = vpop.f32.mrf.mxu2 }
 0x137   :  { %v409_v31 = vadd.f32 %v408_v29, %v331_v24 }
 0x139   :  { %v1488_v33 = vmax.f32 %v409_v31, 0.0  ;;  %v1709_v31 = vld [vmem:[%s2086_s5 + $0x5] ss:$8 sm:$0xf] }
 0x13b   :  { %2097 = vst [vmem:[#allocation4_spill] sm:$0xff] %v1488_v33 }
 0x13e   :  { %v411_v43 = vpop.f32.mrf.mxu2 }
 0x13f   :  { %v412_v45 = vadd.f32 %v411_v43, %v336_v36 }
 0x141   :  { %v1580_v47 = vmax.f32 %v412_v45, 0.0 }
 0x146   :  { %v362_v27 = vpop.f32.mrf.mxu0 }
 0x147   :  { %v385_v25 = vpop.f32.mrf.mxu1  ;;  %v363_v30 = vadd.f32 %v362_v27, %v331_v24 }
 0x148   :  { %v386_v26 = vadd.f32 %v385_v25, %v331_v24 }
 0x149   :  { %v1486_v32 = vmax.f32 %v363_v30, 0.0  ;;  %v927_v30 = vld [vmem:[%s2089_s4] sm:$0xff] }
 0x14a   :  { %v1478_v28 = vmax.f32 %v386_v26, 0.0 }
 0x14c   :  { %549 = vrot.lane.b32.xlu0 %v1478_v28, %s1151_s0  ;;  %707 = vrot.lane.b32.xlu2 %v1478_v28, %s1148_s25 }
 0x14d   :  { %757 = vrot.lane.b32.xlu1 %v1478_v28, %s1146_s23  ;;  %v431_v34 = vpop.f32.mrf.mxu3 }
 0x14e   :  { %v432_v35 = vadd.f32 %v431_v34, %v331_v24  ;;  %v365_v38 = vpop.f32.mrf.mxu0  ;;  %v2092_v34 = vperm.slane %v1709_v31, 2 }
 0x14f   :  { %v388_v3 = vpop.f32.mrf.mxu1  ;;  %v366_v39 = vadd.f32 %v365_v38, %v336_v36 }
 0x150   :  { %v1496_v2 = vmax.f32 %v432_v35, 0.0  ;;  %v389_v37 = vadd.f32 %v388_v3, %v336_v36 }
 0x151   :  { %v1530_v40 = vmax.f32 %v366_v39, 0.0 }
 0x152   :  { %v1522_v1 = vmax.f32 %v389_v37, 0.0 }
 0x154   :  { %711 = vrot.lane.b32.xlu0 %v1488_v33, %s1148_s25  ;;  %753 = vrot.lane.b32.xlu2 %v1486_v32, %s1146_s23 }
 0x155   :  { %657 = vrot.lane.b32.xlu1 %v1478_v28, %s1149_s30  ;;  %v434_v51 = vpop.f32.mrf.mxu3 }
 0x156   :  { %v435_v52 = vadd.f32 %v434_v51, %v336_v36 }
 0x158   :  { %v1608_v59 = vmax.f32 %v435_v52, 0.0  ;;  %v779_v52 = vperm.slane %v1613_v60, 0 }
 0x15c   :  { %703 = vrot.lane.b32.xlu2 %v1486_v32, %s1148_s25  ;;  %765 = vrot.lane.b32.xlu0 %v1496_v2, %s1146_s23 }
 0x15d   :  { %595 = vrot.lane.b32.xlu1 %v1486_v32, %s1150_s9 }
 0x164   :  { %653 = vrot.lane.b32.xlu2 %v1486_v32, %s1149_s30  ;;  %715 = vrot.lane.b32.xlu0 %v1496_v2, %s1148_s25 }
 0x165   :  { %495 = vrot.lane.b32.xlu1 %v1486_v32, %s1152_s10 }
 0x16c   :  { %599 = vrot.lane.b32.xlu2 %v1478_v28, %s1150_s9  ;;  %665 = vrot.lane.b32.xlu0 %v1496_v2, %s1149_s30 }
 0x16d   :  { %445 = vrot.lane.b32.xlu1 %v1486_v32, %s1153_s11 }
 0x174   :  { %545 = vrot.lane.b32.xlu2 %v1486_v32, %s1151_s0  ;;  %607 = vrot.lane.b32.xlu0 %v1496_v2, %s1150_s9 }
 0x175   :  { %557 = vrot.lane.b32.xlu1 %v1496_v2, %s1151_s0 }
 0x17c   :  { %499 = vrot.lane.b32.xlu2 %v1478_v28, %s1152_s10  ;;  %553 = vrot.lane.b32.xlu0 %v1488_v33, %s1151_s0 }
 0x17d   :  { %759 = vrot.lane.b32.xlu1 %v1522_v1, %s1146_s23 }
 0x184   :  { %449 = vrot.lane.b32.xlu2 %v1478_v28, %s1153_s11  ;;  %815 = vrot.lane.b32.xlu0 %v1496_v2, %s1147_s24 }
 0x185   :  { %755 = vrot.lane.b32.xlu1 %v1530_v40, %s1146_s23 }
 0x18c   :  { %761 = vrot.lane.b32.xlu2 %v1488_v33, %s1146_s23  ;;  %507 = vrot.lane.b32.xlu0 %v1496_v2, %s1152_s10 }
 0x18d   :  { %655 = vrot.lane.b32.xlu1 %v1530_v40, %s1149_s30 }
 0x194   :  { %661 = vrot.lane.b32.xlu2 %v1488_v33, %s1149_s30  ;;  %709 = vrot.lane.b32.xlu0 %v1522_v1, %s1148_s25 }
 0x195   :  { %601 = vrot.lane.b32.xlu1 %v1522_v1, %s1150_s9 }
 0x19c   :  { %603 = vrot.lane.b32.xlu2 %v1488_v33, %s1150_s9  ;;  %659 = vrot.lane.b32.xlu0 %v1522_v1, %s1149_s30 }
 0x19d   :  { %551 = vrot.lane.b32.xlu1 %v1522_v1, %s1151_s0 }
 0x1a4   :  { %811 = vrot.lane.b32.xlu2 %v1488_v33, %s1147_s24  ;;  %705 = vrot.lane.b32.xlu0 %v1530_v40, %s1148_s25 }
 0x1a5   :  { %501 = vrot.lane.b32.xlu1 %v1522_v1, %s1152_s10 }
 0x1a6   :  { %v708_v41 = vpop.permute.xlu2 %707 }
 0x1ac   :  { %503 = vrot.lane.b32.xlu2 %v1488_v33, %s1152_s10  ;;  %597 = vrot.lane.b32.xlu0 %v1530_v40, %s1150_s9 }
 0x1ad   :  { %447 = vrot.lane.b32.xlu1 %v1530_v40, %s1153_s11 }
 0x1ae   :  { %v1568_v42 = vpop.permute.xlu2 %753 }
 0x1b4   :  { %451 = vrot.lane.b32.xlu2 %v1522_v1, %s1153_s11  ;;  %547 = vrot.lane.b32.xlu0 %v1530_v40, %s1151_s0 }
 0x1b5   :  { %805 = vrot.lane.b32.xlu1 %v1530_v40, %s1147_s24 }
 0x1b6   :  { %v704_v44 = vpop.permute.xlu2 %703 }
 0x1b7   :  { %v1578_v46 = vsel %vm200_vm0, %v704_v44, %v708_v41 }
 0x1bc   :  { %809 = vrot.lane.b32.xlu2 %v1522_v1, %s1147_s24  ;;  %497 = vrot.lane.b32.xlu0 %v1530_v40, %s1152_s10 }
 0x1bd   :  { %713 = vrot.lane.b32.xlu1 %v1580_v47, %s1148_s25 }
 0x1be   :  { %v1588_v48 = vpop.permute.xlu0 %549  ;;  %v654_v49 = vpop.permute.xlu2 %653 }
 0x1bf   :  { %v1590_v50 = vpop.permute.xlu1 %757 }
 0x1c4   :  { %763 = vrot.lane.b32.xlu2 %v1580_v47, %s1146_s23  ;;  %555 = vrot.lane.b32.xlu0 %v1580_v47, %s1151_s0 }
 0x1c5   :  { %663 = vrot.lane.b32.xlu1 %v1580_v47, %s1149_s30 }
 0x1c6   :  { %v712_v53 = vpop.permute.xlu0 %711  ;;  %v1598_v54 = vpop.permute.xlu2 %599 }
 0x1c7   :  { %v1602_v55 = vsel %vm200_vm0, %v708_v41, %v712_v53  ;;  %v658_v56 = vpop.permute.xlu1 %657 }
 0x1c8   :  { %v1606_v57 = vsel %vm168_vm3, %v654_v49, %v658_v56 }
 0x1cc   :  { %767 = vrot.lane.b32.xlu2 %v1608_v59, %s1146_s23  ;;  %817 = vrot.lane.b32.xlu0 %v1608_v59, %s1147_s24 }
 0x1cd   :  { %717 = vrot.lane.b32.xlu1 %v1608_v59, %s1148_s25 }
 0x1ce   :  { %v766_v62 = vpop.permute.xlu0 %765  ;;  %v546_v0 = vpop.permute.xlu2 %545 }
 0x1cf   :  { %v596_v5 = vpop.permute.xlu1 %595  ;;  %v775_v6 = vsel %vm232_vm2, %v766_v62, %v1568_v42  ;;  %v1628_v63 = vsel %vm100_vm5, %v546_v0, %v1588_v48 }
 0x1d0   :  { %v1633_v7 = vsel %vm132_vm4, %v596_v5, %v1598_v54  ;;  %v1637_v8 = vmul.f32 %v782_v61, %v775_v6 }
 0x1d4   :  { %667 = vrot.lane.b32.xlu2 %v1608_v59, %s1149_s30  ;;  %505 = vrot.lane.b32.xlu0 %v1580_v47, %s1152_s10 }
 0x1d5   :  { %605 = vrot.lane.b32.xlu1 %v1580_v47, %s1150_s9 }
 0x1d6   :  { %v716_v14 = vpop.permute.xlu0 %715  ;;  %v500_v12 = vpop.permute.xlu2 %499 }
 0x1d7   :  { %v496_v15 = vpop.permute.xlu1 %495  ;;  %v719_v58 = vsel %vm200_vm0, %v712_v53, %v716_v14  ;;  %v1655_v16 = vsel %vm200_vm0, %v716_v14, %v704_v44  ;;  %v773_v53 = vsel %vm232_vm2, %v1568_v42, %v1590_v50 }
 0x1d8   :  { %v1659_v17 = vmul.f32 %v2093_v13, %v719_v58  ;;  %v1663_v9 = vsel %vm68_vm6, %v496_v15, %v500_v12  ;;  %v780_v13 = vperm.slane %v1613_v60, 1 }
 0x1dc   :  { %609 = vrot.lane.b32.xlu2 %v1608_v59, %s1150_s9  ;;  %455 = vrot.lane.b32.xlu0 %v1580_v47, %s1153_s11 }
 0x1dd   :  { %559 = vrot.lane.b32.xlu1 %v1608_v59, %s1151_s0 }
 0x1de   :  { %v666_v18 = vpop.permute.xlu0 %665  ;;  %v1671_v4 = vpop.permute.xlu2 %449 }
 0x1df   :  { %v1673_v19 = vpop.permute.xlu1 %445  ;;  %v1677_v20 = vsel %vm168_vm3, %v666_v18, %v654_v49 }
 0x1e4   :  { %813 = vrot.lane.b32.xlu2 %v1580_v47, %s1147_s24  ;;  %807 = vrot.lane.b32.xlu0 %v1478_v28, %s1147_s24 }
 0x1e5   :  { %509 = vrot.lane.b32.xlu1 %v1608_v59, %s1152_s10 }
 0x1e6   :  { %v608_v22 = vpop.permute.xlu0 %607  ;;  %v1686_v23 = vpop.permute.xlu2 %761 }
 0x1e7   :  { %v558_v24 = vpop.permute.xlu1 %557  ;;  %v1690_v25 = vsel %vm132_vm4, %v608_v22, %v596_v5  ;;  %v769_v26 = vsel %vm232_vm2, %v1686_v23, %v766_v62 }
 0x1e8   :  { %v1697_v27 = vsel %vm100_vm5, %v558_v24, %v546_v0  ;;  %v1701_v29 = vmul.f32 %v2094_v21, %v769_v26  ;;  %v787_v0 = vmul.f32 %v779_v52, %v773_v53 }
 0x1ec   :  { %803 = vrot.lane.b32.xlu2 %v1486_v32, %s1147_s24  ;;  %930 = vperm.xlu0 %1145, %v927_v30  }
 0x1ed   :  { %459 = vrot.lane.b32.xlu1 %v1608_v59, %s1153_s11 }
 0x1ee   :  { %v554_v35 = vpop.permute.xlu0 %553  ;;  %v662_v3 = vpop.permute.xlu2 %661 }
 0x1ef   :  { %v1718_v36 = vsel %vm100_vm5, %v554_v35, %v558_v24  ;;  %v1723_v37 = vsel %vm100_vm5, %v1588_v48, %v554_v35  ;;  %v760_v38 = vpop.permute.xlu1 %759  ;;  %v669_v39 = vsel %vm168_vm3, %v662_v3, %v666_v18  ;;  %v1729_v41 = vsel %vm168_vm3, %v658_v56, %v662_v3 }
 0x1f0   :  { %2098 = vst [vmem:[#allocation5_spill] sm:$0xff] %v1723_v37  ;;  %v1733_v43 = vmul.f32 %v2092_v34, %v669_v39  ;;  %v729_v39 = vperm.slane %v1642_v10, 0 }
 0x1f4   :  { %457 = vrot.lane.b32.xlu2 %v1496_v2, %s1153_s11 }
 0x1f5   :  { %453 = vrot.lane.b32.xlu1 %v1488_v33, %s1153_s11 }
 0x1f6   :  { %v1739_v44 = vpop.permute.xlu0 %815  ;;  %v604_v45 = vpop.permute.xlu2 %603 }
 0x1f7   :  { %v756_v48 = vpop.permute.xlu1 %755  ;;  %v1743_v49 = vsel %vm132_vm4, %v604_v45, %v608_v22  ;;  %v1748_v51 = vsel %vm132_vm4, %v1598_v54, %v604_v45 }
 0x1f8   :  { %2099 = vst [vmem:[#allocation6_spill] sm:$0xff] %v1748_v51  ;;  %v774_v56 = vsel %vm232_vm2, %v756_v48, %v760_v38 }
 0x1f9   :  { %v791_v62 = vmul.f32 %v779_v52, %v774_v56  ;;  %v737_v56 = vmul.f32 %v729_v39, %v1578_v46 }
 0x1fb   :  { %937 = vmatpush.msrb.mxu0 %v791_v62  ;;  %v679_v62 = vperm.slane %v1709_v31, 0 }
 0x1fd   :  { %938 = vmatpush.msrb.mxu0 %v787_v0  ;;  %v687_v34 = vmul.f32 %v679_v62, %v1606_v57  ;;  %v1812_v57 = vld [vmem:[%s2086_s5 + $0x20] ss:$8 sm:$0xf] }
 0x1fe   :  { %v508_v5 = vpop.permute.xlu0 %507  ;;  %v1757_v6 = vpop.permute.xlu2 %811 }
 0x1ff   :  { %v1761_v54 = vsel %vm68_vm6, %v508_v5, %v496_v15  ;;  %v1763_v14 = vpop.permute.xlu1 %655 }
 0x206   :  { %v710_v58 = vpop.permute.xlu0 %709  ;;  %v504_v18 = vpop.permute.xlu2 %503 }
 0x207   :  { %v1765_v22 = vpop.permute.xlu1 %601  ;;  %v1769_v42 = vsel %vm68_vm6, %v504_v18, %v508_v5  ;;  %v1773_v24 = vsel %vm68_vm6, %v500_v12, %v504_v18 }
 0x208   :  { %2100 = vst [vmem:[#allocation7_spill] sm:$0xff] %v1773_v24 }
 0x20e   :  { %v660_v26 = vpop.permute.xlu0 %659  ;;  %v1775_v30 = vpop.permute.xlu2 %451 }
 0x20f   :  { %v1777_v35 = vpop.permute.xlu1 %551  ;;  %v674_v12 = vsel %vm168_vm3, %v1763_v14, %v660_v26 }
 0x210   :  { %v691_v0 = vmul.f32 %v679_v62, %v674_v12 }
 0x216   :  { %v1779_v15 = vpop.permute.xlu0 %705  ;;  %v1781_v3 = vpop.permute.xlu2 %809 }
 0x217   :  { %v724_v45 = vsel %vm200_vm0, %v1779_v15, %v710_v58  ;;  %v1787_v52 = vpop.permute.xlu1 %501 }
 0x218   :  { %v741_v53 = vmul.f32 %v729_v39, %v724_v45  ;;  %v771_v45 = vsel %vm232_vm2, %v1590_v50, %v1686_v23  ;;  %v2095_v50 = vperm.slane %v1812_v57, 0 }
 0x219   :  { %v788_v12 = vmul.f32 %v780_v13, %v771_v45 }
 0x21a   :  { %939 = vmatpush.msrb.mxu0 %v741_v53 }
 0x21c   :  { %940 = vmatpush.msrb.mxu0 %v737_v56 }
 0x21e   :  { %v598_v5 = vpop.permute.xlu0 %597  ;;  %941 = vmatpush.msrb.mxu0 %v691_v0  ;;  %v1794_v18 = vpop.permute.xlu2 %763 }
 0x21f   :  { %v1802_v53 = vpop.permute.xlu1 %447  ;;  %v772_v46 = vsel %vm232_vm2, %v760_v38, %v1794_v18  ;;  %v616_v24 = vsel %vm132_vm4, %v598_v5, %v1765_v22 }
 0x220   :  { %942 = vmatpush.msrb.mxu0 %v687_v34  ;;  %v792_v39 = vmul.f32 %v780_v13, %v772_v46 }
 0x222   :  { %943 = vmatpush.msrb.mxu0 %v1530_v40  ;;  %977 = vmatpush.msrb.mxu2 %v792_v39 }
 0x224   :  { %944 = vmatpush.msrb.mxu0 %v1486_v32  ;;  %978 = vmatpush.msrb.mxu2 %v788_v12  ;;  %v1846_v12 = vld [vmem:[%s2086_s5 + $0x3] ss:$8 sm:$0xf] }
 0x226   :  { %v1815_v23 = vpop.permute.xlu0 %547  ;;  %v1817_v56 = vpop.permute.xlu2 %767 }
 0x227   :  { %v1819_v34 = vpop.permute.xlu1 %805  ;;  %v776_v40 = vsel %vm232_vm2, %v1817_v56, %v756_v48  ;;  %v730_v48 = vperm.slane %v1642_v10, 1 }
 0x228   :  { %v824_v32 = vsel %vm264_vm1, %v1819_v34, %v1781_v3  ;;  %v794_v13 = vmul.f32 %v782_v61, %v776_v40 }
 0x229   :  { %v841_v38 = vmul.f32 %v2095_v50, %v824_v32  ;;  %v738_v61 = vmul.f32 %v730_v48, %v1602_v55  ;;  %v680_v55 = vperm.slane %v1709_v31, 1 }
 0x22b   :  { %971 = vmatpush.msrb.mxu1 %v841_v38  ;;  %v621_v38 = vperm.slane %v1846_v12, 0  ;;  %v688_v50 = vmul.f32 %v680_v55, %v1729_v41  ;;  %v831_v41 = vperm.slane %v1812_v57, 2 }
 0x22e   :  { %v1832_v62 = vpop.permute.xlu0 %497  ;;  %v1834_v0 = vpop.permute.xlu2 %667 }
 0x22f   :  { %v1836_v45 = vpop.permute.xlu1 %713 }
 0x230   :  { %v722_v46 = vsel %vm200_vm0, %v710_v58, %v1836_v45 }
 0x231   :  { %v742_v39 = vmul.f32 %v730_v48, %v722_v46 }
 0x233   :  { %979 = vmatpush.msrb.mxu2 %v742_v39 }
 0x235   :  { %980 = vmatpush.msrb.mxu2 %v738_v61  ;;  %v629_v61 = vmul.f32 %v621_v38, %v1690_v25 }
 0x236   :  { %v1848_v40 = vpop.permute.xlu0 %555  ;;  %v1850_v32 = vpop.permute.xlu2 %609 }
 0x237   :  { %v1853_v21 = vpop.permute.xlu1 %663  ;;  %v618_v58 = vsel %vm132_vm4, %v1850_v32, %v598_v5  ;;  %v819_v5 = vsel %vm264_vm1, %v1757_v6, %v1739_v44 }
 0x238   :  { %v672_v48 = vsel %vm168_vm3, %v660_v26, %v1853_v21  ;;  %v633_v46 = vmul.f32 %v621_v38, %v618_v58  ;;  %v622_v26 = vperm.slane %v1846_v12, 1  ;;  %v566_v58 = vsel %vm100_vm5, %v1815_v23, %v1777_v35 }
 0x239   :  { %v692_v39 = vmul.f32 %v680_v55, %v672_v48  ;;  %v839_v48 = vmul.f32 %v831_v41, %v819_v5 }
 0x23a   :  { %945 = vmatpush.msrb.mxu0 %v633_v46  ;;  %v630_v55 = vmul.f32 %v622_v26, %v1633_v7  ;;  %v516_v7 = vsel %vm68_vm6, %v1832_v62, %v1787_v52 }
 0x23b   :  { %981 = vmatpush.msrb.mxu2 %v692_v39  ;;  %v1896_v39 = vld [vmem:[%s2086_s5 + $0x1] ss:$8 sm:$0xf] }
 0x23c   :  { %946 = vmatpush.msrb.mxu0 %v629_v61  ;;  %v732_v61 = vperm.slane %v1642_v10, 3  ;;  %v522_v5 = vperm.slane %v1896_v39, 1 }
 0x23d   :  { %982 = vmatpush.msrb.mxu2 %v688_v50  ;;  %v1880_v50 = vld [vmem:[%s2086_s5 + $0x2] ss:$8 sm:$0xf] }
 0x23e   :  { %v1867_v37 = vpop.permute.xlu0 %817  ;;  %v814_v51 = vpop.permute.xlu2 %813  ;;  %v572_v46 = vperm.slane %v1880_v50, 1 }
 0x23f   :  { %v1869_v33 = vpop.permute.xlu1 %717  ;;  %983 = vmatpush.msrb.mxu2 %v1522_v1  ;;  %v820_v25 = vsel %vm264_vm1, %v814_v51, %v1867_v37  ;;  %v634_v1 = vmul.f32 %v622_v26, %v616_v24  ;;  %v1912_v26 = vld [vmem:[%s2090_s3 + $0x8] sm:$0xff] }
 0x240   :  { %v843_v38 = vmul.f32 %v831_v41, %v820_v25  ;;  %v584_v24 = vmul.f32 %v572_v46, %v566_v58  ;;  %v580_v41 = vmul.f32 %v572_v46, %v1628_v63  ;;  %v534_v63 = vmul.f32 %v522_v5, %v516_v7 }
 0x241   :  { %984 = vmatpush.msrb.mxu2 %v1478_v28  ;;  %v726_v28 = vsel %vm200_vm0, %v1869_v33, %v1779_v15  ;;  %v740_v58 = vmul.f32 %v732_v61, %v1655_v16  ;;  %v830_v16 = vperm.slane %v1812_v57, 1  ;;  %v822_v7 = vsel %vm264_vm1, %v1781_v3, %v814_v51 }
 0x242   :  { %1051 = vmatpush.msrb.mxu3 %v843_v38  ;;  %v676_v38 = vsel %vm168_vm3, %v1834_v0, %v1763_v14  ;;  %v465_v14 = vsel %vm37_vm7, %v1673_v19, %v1671_v4 }
 0x243   :  { %985 = vmatpush.msrb.mxu2 %v634_v1  ;;  %v744_v1 = vmul.f32 %v732_v61, %v726_v28 }
 0x244   :  { %1052 = vmatpush.msrb.mxu3 %v839_v48  ;;  %v530_v48 = vmul.f32 %v522_v5, %v1663_v9 }
 0x245   :  { %986 = vmatpush.msrb.mxu2 %v630_v55  ;;  %1133 = vmatmul.msk.f32.vlgmr.msrb.gmra.mxu3 %vm933_vm9, %v1912_v26  ;;  %v682_v55 = vperm.slane %v1709_v31, 3 }
 0x246   :  { %1057 = vmatpush.msra.mxu3 %v794_v13  ;;  %v1907_v25 = vpop.permute.xlu0 %505  ;;  %v1924_v13 = vld [vmem:[%s2086_s5] ss:$8 sm:$0xf] }
 0x247   :  { %v1914_v15 = vpop.permute.xlu1 %605  ;;  %987 = vmatpush.msrb.mxu2 %v584_v24  ;;  %v472_v46 = vperm.slane %v1924_v13, 1  ;;  %v694_v28 = vmul.f32 %v682_v55, %v676_v38  ;;  %v690_v61 = vmul.f32 %v682_v55, %v1677_v20  ;;  %v571_v38 = vperm.slane %v1880_v50, 0  ;;  %v1965_v55 = vpop.permute.xlu2 %803 }
 0x248   :  { %1058 = vmatpush.msra.mxu3 %v1637_v8  ;;  %v466_v8 = vsel %vm37_vm7, %v1802_v53, %v1775_v30  ;;  %v612_v51 = vsel %vm132_vm4, %v1914_v15, %v1850_v32 }
 0x249   :  { %988 = vmatpush.msrb.mxu2 %v580_v41  ;;  %v484_v24 = vmul.f32 %v472_v46, %v466_v8  ;;  %v480_v5 = vmul.f32 %v472_v46, %v465_v14  ;;  %v770_v14 = vsel %vm232_vm2, %v1794_v18, %v1817_v56  ;;  %v2101_v18 = vperm.slane %v1812_v57, 0 }
 0x24a   :  { %1059 = vmatpush.msra.mxu3 %v744_v1  ;;  %v1952_v1 = vld [vmem:[%s2090_s3] sm:$0xff] }
 0x24b   :  { %989 = vmatpush.msrb.mxu2 %v534_v63  ;;  %v842_v63 = vmul.f32 %v830_v16, %v822_v7 }
 0x24c   :  { %1060 = vmatpush.msra.mxu3 %v740_v58  ;;  %v624_v58 = vperm.slane %v1846_v12, 3 }
 0x24d   :  { %990 = vmatpush.msrb.mxu2 %v530_v48  ;;  %v574_v48 = vperm.slane %v1880_v50, 3 }
 0x24e   :  { %1061 = vmatpush.msra.mxu3 %v694_v28  ;;  %v1947_v9 = vpop.permute.xlu0 %455  ;;  %v636_v8 = vmul.f32 %v624_v58, %v612_v51  ;;  %v632_v46 = vmul.f32 %v624_v58, %v1743_v49 }
 0x24f   :  { %v560_v41 = vpop.permute.xlu1 %559  ;;  %991 = vmatpush.msrb.mxu2 %v484_v24  ;;  %v521_v24 = vperm.slane %v1896_v39, 0 }
 0x250   :  { %v568_v20 = vsel %vm100_vm5, %v560_v41, %v1815_v23  ;;  %1062 = vmatpush.msra.mxu3 %v690_v61  ;;  %v579_v23 = vmul.f32 %v571_v38, %v1697_v27  ;;  %v562_v32 = vsel %vm100_vm5, %v1848_v40, %v560_v41 }
 0x251   :  { %992 = vmatpush.msrb.mxu2 %v480_v5  ;;  %v583_v3 = vmul.f32 %v571_v38, %v568_v20  ;;  %v586_v61 = vmul.f32 %v574_v48, %v562_v32  ;;  %v524_v20 = vperm.slane %v1896_v39, 3  ;;  %v2104_v32 = vperm.slane %v1709_v31, 2 }
 0x252   :  { %993 = vmatmul.f32.vlgmr.msrb.gmra.mxu2 %v1952_v1  ;;  %1063 = vmatpush.msra.mxu3 %v1608_v59 }
 0x253   :  { %1011 = vmatpush.msra.mxu2 %v842_v63  ;;  %947 = vmatpush.msrb.mxu0 %v583_v3  ;;  %v458_v63 = vpop.permute.xlu2 %457  ;;  %v2103_v3 = vperm.slane %v1642_v10, 2 }
 0x254   :  { %1064 = vmatpush.msra.mxu3 %v1496_v2  ;;  %v467_v10 = vsel %vm37_vm7, %v458_v63, %v1673_v19  ;;  %v826_v19 = vsel %vm264_vm1, %v1867_v37, %v1819_v34  ;;  %v623_v34 = vperm.slane %v1846_v12, 2 }
 0x255   :  { %948 = vmatpush.msrb.mxu0 %v579_v23  ;;  %v471_v23 = vperm.slane %v1924_v13, 0 }
 0x256   :  { %1065 = vmatpush.msra.mxu3 %v636_v8  ;;  %v808_v59 = vpop.permute.xlu0 %807 }
 0x257   :  { %v821_v2 = vsel %vm264_vm1, %v808_v59, %v1757_v6  ;;  %v823_v27 = vsel %vm264_vm1, %v1965_v55, %v808_v59  ;;  %v510_v28 = vpop.permute.xlu1 %509  ;;  %v2102_v6 = vperm.slane %v1613_v60, 2  ;;  %v529_v60 = vmul.f32 %v521_v24, %v1761_v54 }
 0x258   :  { %v838_v49 = vmul.f32 %v830_v16, %v821_v2  ;;  %v518_v7 = vsel %vm68_vm6, %v510_v28, %v1832_v62  ;;  %1066 = vmatpush.msra.mxu3 %v632_v46  ;;  %v837_v56 = vmul.f32 %v2101_v18, %v823_v27  ;;  %v512_v38 = vsel %vm68_vm6, %v1907_v25, %v510_v28  ;;  %v2107_v27 = vld [vmem:[#allocation5_spill] sm:$0xff] }
 0x259   :  { %v533_v41 = vmul.f32 %v521_v24, %v518_v7  ;;  %v793_v5 = vmul.f32 %v2102_v6, %v770_v14  ;;  %v582_v16 = vmul.f32 %v574_v48, %v1718_v36  ;;  %v720_v62 = vsel %vm200_vm0, %v1836_v45, %v1869_v33  ;;  %v2105_v14 = vld [vmem:[#allocation4_spill] sm:$0xff] }
 0x25a   :  { %1067 = vmatpush.msra.mxu3 %v586_v61  ;;  %972 = vmatpush.msrb.mxu1 %v837_v56  ;;  %v536_v51 = vmul.f32 %v524_v20, %v512_v38  ;;  %v474_v36 = vperm.slane %v1924_v13, 3  ;;  %v743_v58 = vmul.f32 %v2103_v3, %v720_v62  ;;  %v532_v33 = vmul.f32 %v524_v20, %v1769_v42 }
 0x25b   :  { %949 = vmatpush.msrb.mxu0 %v533_v41  ;;  %1012 = vmatpush.msra.mxu2 %v838_v49  ;;  %v670_v54 = vsel %vm168_vm3, %v1853_v21, %v1834_v0  ;;  %v832_v21 = vperm.slane %v1812_v57, 3  ;;  %v479_v46 = vmul.f32 %v471_v23, %v467_v10  ;;  %v473_v28 = vperm.slane %v1924_v13, 2 }
 0x25c   :  { %1132 = vmatmul.msk.f32.vlgmr.msra.gmra.mxu2 %vm933_vm9, %v1912_v26  ;;  %1017 = vmatpush.msra.mxu1 %v793_v5  ;;  %v693_v48 = vmul.f32 %v2104_v32, %v670_v54  ;;  %v464_v24 = vsel %vm37_vm7, %v1775_v30, %v1947_v9 }
 0x25d   :  { %1068 = vmatpush.msra.mxu3 %v582_v16  ;;  %950 = vmatpush.msrb.mxu0 %v529_v60  ;;  %v844_v57 = vmul.f32 %v832_v21, %v826_v19 }
 0x25e   :  { %1018 = vmatpush.msra.mxu1 %v1701_v29  ;;  %v931_v49 = vpop.permute.xlu0 %930 }
 0x25f   :  { %1069 = vmatpush.msra.mxu3 %v536_v51  ;;  %v460_v45 = vpop.permute.xlu1 %459  ;;  %1131 = vmatmul.msk.f32.vlgmr.msrb.gmra.mxu1 %vm933_vm9, %v1912_v26 }
 0x260   :  { %v462_v29 = vsel %vm37_vm7, %v1947_v9, %v460_v45  ;;  %v468_v42 = vsel %vm37_vm7, %v460_v45, %v1802_v53  ;;  %1019 = vmatpush.msra.mxu1 %v743_v58  ;;  %v825_v53 = vsel %vm264_vm1, %v1739_v44, %v1965_v55 }
 0x261   :  { %v486_v0 = vmul.f32 %v474_v36, %v462_v29  ;;  %1070 = vmatpush.msra.mxu3 %v532_v33  ;;  %v483_v8 = vmul.f32 %v471_v23, %v468_v42  ;;  %v840_v31 = vmul.f32 %v832_v21, %v825_v53 }
 0x262   :  { %1020 = vmatpush.msra.mxu1 %v1659_v17  ;;  %v614_v17 = vsel %vm132_vm4, %v1765_v22, %v1914_v15  ;;  %v573_v22 = vperm.slane %v1880_v50, 2  ;;  %v2106_v15 = vld [vmem:[#allocation6_spill] sm:$0xff] }
 0x263   :  { %951 = vmatpush.msrb.mxu0 %v483_v8  ;;  %1071 = vmatpush.msra.mxu3 %v486_v0  ;;  %v635_v59 = vmul.f32 %v623_v34, %v614_v17  ;;  %v631_v12 = vmul.f32 %v623_v34, %v2106_v15 }
 0x264   :  { %1021 = vmatpush.msra.mxu1 %v693_v48 }
 0x265   :  { %952 = vmatpush.msrb.mxu0 %v479_v46 }
 0x266   :  { %953 = vmatmul.f32.vlgmr.msrb.gmra.mxu0 %v1952_v1  ;;  %1022 = vmatpush.msra.mxu1 %v1733_v43  ;;  %v564_v43 = vsel %vm100_vm5, %v1777_v35, %v1848_v40  ;;  %v581_v35 = vmul.f32 %v573_v22, %v2107_v27  ;;  %v523_v40 = vperm.slane %v1896_v39, 2 }
 0x267   :  { %1091 = vmatpush.msra.mxu0 %v844_v57  ;;  %v454_v37 = vpop.permute.xlu1 %453  ;;  %v585_v2 = vmul.f32 %v573_v22, %v564_v43 }
 0x268   :  { %v461_v44 = vsel %vm37_vm7, %v454_v37, %v458_v63  ;;  %1023 = vmatpush.msra.mxu1 %v1580_v47  ;;  %v514_v47 = vsel %vm68_vm6, %v1787_v52, %v1907_v25  ;;  %v463_v52 = vsel %vm37_vm7, %v1671_v4, %v454_v37  ;;  %v485_v25 = vmul.f32 %v473_v28, %v464_v24 }
 0x269   :  { %v482_v55 = vmul.f32 %v474_v36, %v461_v44  ;;  %1092 = vmatpush.msra.mxu0 %v840_v31  ;;  %v535_v50 = vmul.f32 %v523_v40, %v514_v47  ;;  %v481_v39 = vmul.f32 %v473_v28, %v463_v52 }
 0x26a   :  { %1024 = vmatpush.msra.mxu1 %v2105_v14 }
 0x26b   :  { %1072 = vmatpush.msra.mxu3 %v482_v55 }
 0x26c   :  { %1025 = vmatpush.msra.mxu1 %v635_v59  ;;  %1073 = vmatmul.f32.vlgmr.msra.gmra.mxu3 %v1952_v1 }
 0x26e   :  { %1026 = vmatpush.msra.mxu1 %v631_v12  ;;  %1134 = vmatmul.msk.f32.vlgmr.msra.gmra.mxu0 %vm933_vm9, %v1912_v26  ;;  %v2108_v26 = vld [vmem:[#allocation7_spill] sm:$0xff] }
 0x26f   :  { %v531_v61 = vmul.f32 %v523_v40, %v2108_v26 }
 0x270   :  { %1027 = vmatpush.msra.mxu1 %v585_v2 }
 0x272   :  { %1028 = vmatpush.msra.mxu1 %v581_v35 }
 0x274   :  { %1029 = vmatpush.msra.mxu1 %v535_v50 }
 0x276   :  { %1030 = vmatpush.msra.mxu1 %v531_v61 }
 0x278   :  { %1031 = vmatpush.msra.mxu1 %v485_v25 }
 0x27a   :  { %1032 = vmatpush.msra.mxu1 %v481_v39 }
 0x27b   :  { %1033 = vmatmul.f32.vlgmr.msra.gmra.mxu1 %v1952_v1 }
 0x2c8   :  { %v1054_v4 = vpop.f32.mrf.mxu3 }
 0x2d5   :  { %v994_v13 = vpop.f32.mrf.mxu2 }
 0x2d6   :  { %v995_v7 = vadd.f32 %v994_v13, %v931_v49 }
 0x2dc   :  { %v974_v41 = vpop.f32.mrf.mxu1 }
 0x2df   :  { %v1014_v18 = vpop.f32.mrf.mxu2 }
 0x2e0   :  { %v1015_v56 = vadd.f32 %v1014_v18, %v995_v7 }
 0x2e2   :  { %v1098_v30 = vmax.f32 %v1015_v56, 0.0 }
 0x2e3   :  { %v954_v9 = vpop.f32.mrf.mxu0 }
 0x2e4   :  { %1102 = vst [vmem:[%s2091_s6 + $0x8] sm:$0xff] %v1098_v30  ;;  %v955_v11 = vadd.f32 %v954_v9, %v931_v49 }
 0x2e6   :  { %v975_v6 = vadd.f32 %v974_v41, %v955_v11 }
 0x2e8   :  { %v1097_v5 = vmax.f32 %v975_v6, 0.0 }
 0x2ea   :  { %1101 = vst [vmem:[%s2091_s6] sm:$0xff] %v1097_v5 }
 0x2eb   :  { %v1094_v38 = vpop.f32.mrf.mxu0 }
 0x2ef   :  { %v1074_v1 = vpop.f32.mrf.mxu3 }
 0x2f0   :  { %v1075_v16 = vadd.f32 %v1074_v1, %v931_v49 }
 0x2f2   :  { %v1095_v20 = vadd.f32 %v1094_v38, %v1075_v16 }
 0x2f4   :  { %v1100_v62 = vmax.f32 %v1095_v20, 0.0 }
 0x2f6   :  { %1104 = vst [vmem:[%s2091_s6 + $0x18] sm:$0xff] %v1100_v62 }
 0x2f8   :  { %v1034_v60 = vpop.f32.mrf.mxu1 }
 0x2f9   :  { %v1035_v63 = vadd.f32 %v1034_v60, %v931_v49 }
 0x2fb   :  { %v1055_v51 = vadd.f32 %v1054_v4, %v1035_v63 }
 0x2fd   :  { %v1099_v36 = vmax.f32 %v1055_v51, 0.0 }
 0x2ff   :  { %1103 = vst [vmem:[%s2091_s6 + $0x10] sm:$0xff] %v1099_v36 }

</bundles_post_ra>
